<compile_context>
chip_gen: v7x
topology: tpu7x:2x2x1
jax: 0.10.0
libtpu: 0.0.40
codegen_flags: <defaults>
</compile_context>

<pallas_src>
import functools

import jax
import jax.numpy as jnp
from jax.experimental import pallas as pl
from jax.experimental.pallas import tpu as pltpu


def _round_up(x, m):
    return (x + m - 1) // m * m


def _cdiv(a, b):
    return -(-a // b)


def _norm_kernel(x_ref, alpha_ref, bias_ref, o_ref, *, d, eps):
    """One (tr, d) row-tile of Norm.forward.  All reductions are per-row, so
    any garbage rows in a partial last block never contaminate valid rows
    (their masked stores are dropped by Pallas)."""
    x = x_ref[...].astype(jnp.float32)                      # (tr, d)

    # Two-pass mean / unbiased variance on the VMEM-resident tile: the second
    # pass is pure VPU/XLU work hidden under the HBM-bound pipeline and avoids
    # the catastrophic cancellation of the one-pass (E[x^2] - E[x]^2) form.
    mean = jnp.sum(x, axis=-1, keepdims=True) * (1.0 / d)   # (tr, 1)
    xc = x - mean
    # ddof=1 matches torch.Tensor.std().  NOTE: torch yields nan for d == 1;
    # max(d - 1, 1) avoids a divide-by-zero there instead (not a real case).
    var = jnp.sum(xc * xc, axis=-1, keepdims=True) * (1.0 / max(d - 1, 1))
    std = jnp.sqrt(jnp.maximum(var, 0.0))

    # eps is added to std (matching the reference) -- deliberately NOT folded
    # into rsqrt(var + eps).  EUP approximate reciprocal (separate VLIW slot)
    # plus two Newton steps; O(rows) work, negligible vs the O(rows*d) body.
    denom = std + eps
    r = pl.reciprocal(denom, approx=True)
    r = r * (2.0 - denom * r)
    r = r * (2.0 - denom * r)

    alpha = alpha_ref[...].astype(jnp.float32)              # (1, d)
    bias = bias_ref[...].astype(jnp.float32)                # (1, d)
    o_ref[...] = (xc * r * alpha + bias).astype(o_ref.dtype)


def norm_forward(x, alpha, bias, eps=1e-6):
    """Pallas implementation of Norm.forward.

    x: [..., model_dim]; alpha, bias: [model_dim].

    No host-side padding or output slicing: x is only reshaped to (rows, d)
    (a free view), the lane dim of every BlockSpec is the full feature width
    d, and a partial last row-block (rows % tr != 0) is handled by Pallas'
    masked reads/writes.  This keeps HBM traffic at exactly one read + one
    write of the activation.
    """
    orig_shape = x.shape
    d = orig_shape[-1]
    x2 = x.reshape(-1, d)
    rows = x2.shape[0]

    itemsize = jnp.dtype(x.dtype).itemsize
    sublane = max(8, 32 // itemsize)      # f32: 8, bf16: 16, int8/fp8: 32

    # --- Row-tile size -------------------------------------------------------
    # Per grid step the pipeline holds: double-buffered input + output tiles
    # (2 * 2 * tr*d*itemsize) plus ~3 f32-widened intermediates inside the
    # kernel body (x, xc, out: 3 * tr*d*4 bytes).  Keep the total under
    # ~28 MiB so it fits the explicit vmem_limit below on every generation
    # (v7x: 64 MiB physical; v5e/v6e: 128 MiB).  For f32/d=512 this lands at
    # ~4 MiB of HBM traffic per step, amortizing the ~0.35 us step overhead.
    vmem_budget = 28 * 1024 * 1024
    bytes_per_row = d * (4 * itemsize + 3 * 4)
    tr_budget = max(sublane, (vmem_budget // bytes_per_row) // sublane * sublane)

    if rows <= sublane:
        tr = rows                         # single full-extent block
    else:
        # Keep >= ~4 grid steps so dimension_semantics=("parallel",) can
        # actually spread work across both v7x TensorCores (harmless no-op on
        # single-TC v5e/v6e).
        tr_split = _round_up(_cdiv(rows, 4), sublane)
        tr = min(tr_budget, tr_split)

    num_blocks = _cdiv(rows, tr)          # partial last block is masked

    alpha2 = alpha.reshape(1, d)          # tiny; stay resident across the grid
    bias2 = bias.reshape(1, d)

    kernel = functools.partial(_norm_kernel, d=d, eps=eps)

    out = pl.pallas_call(
        kernel,
        out_shape=jax.ShapeDtypeStruct((rows, d), x.dtype),
        grid_spec=pltpu.PrefetchScalarGridSpec(
            num_scalar_prefetch=0,
            grid=(num_blocks,),
            in_specs=[
                pl.BlockSpec((tr, d), lambda i: (i, 0)),    # x: tiled over rows
                pl.BlockSpec((1, d), lambda i: (0, 0)),     # alpha: resident
                pl.BlockSpec((1, d), lambda i: (0, 0)),     # bias: resident
            ],
            out_specs=pl.BlockSpec((tr, d), lambda i: (i, 0)),
        ),
        compiler_params=pltpu.CompilerParams(
            dimension_semantics=("parallel",),
            vmem_limit_bytes=40 * 1024 * 1024,
        ),
        cost_estimate=pl.CostEstimate(
            flops=8 * rows * d,
            transcendentals=rows,
            bytes_accessed=2 * rows * d * itemsize
            + 2 * d * jnp.dtype(alpha.dtype).itemsize,
        ),
    )(x2, alpha2, bias2)

    return out.reshape(orig_shape)


def _reference_norm(x, alpha, bias, eps=1e-6):
    """Plain-JAX reference (two-pass mean / unbiased std, matching torch)."""
    xf = x.astype(jnp.float32)
    d = xf.shape[-1]
    mean = jnp.mean(xf, axis=-1, keepdims=True)
    std = jnp.sqrt(jnp.sum((xf - mean) ** 2, axis=-1, keepdims=True) / (d - 1))
    return alpha.astype(jnp.float32) * (xf - mean) / (std + eps) + bias.astype(
        jnp.float32
    )


if __name__ == "__main__":
    key = jax.random.PRNGKey(0)
    k0, k1, k2, k3, k4 = jax.random.split(key, 5)

    # --- Main example: shapes implied by the module (batch=2, seq=8, dim=32),
    # alpha/bias = ones matching nn.Parameter(torch.ones(model_dim)) init. ----
    batch, seq, model_dim = 2, 8, 32
    x = jax.random.normal(k0, (batch, seq, model_dim), dtype=jnp.float32)
    alpha = jnp.ones((model_dim,), dtype=jnp.float32)
    bias = jnp.ones((model_dim,), dtype=jnp.float32)

    out = jax.block_until_ready(norm_forward(x, alpha, bias, eps=1e-6))
    ref = _reference_norm(x, alpha, bias, eps=1e-6)
    assert out.shape == ref.shape
    assert jnp.allclose(out, ref, atol=1e-4, rtol=1e-4), "f32 d=32 mismatch"

    # --- Fast path: d % 128 == 0, rows not a multiple of the row tile
    # (partial last block is masked by Pallas). ------------------------------
    d2 = 256
    x_b = jax.random.normal(k1, (2, 13, d2), dtype=jnp.float32)
    alpha_b = 1.0 + 0.1 * jax.random.normal(k2, (d2,), dtype=jnp.float32)
    bias_b = 1.0 + 0.1 * jax.random.normal(k3, (d2,), dtype=jnp.float32)
    out_b = jax.block_until_ready(norm_forward(x_b, alpha_b, bias_b))
    ref_b = _reference_norm(x_b, alpha_b, bias_b)
    assert jnp.allclose(out_b, ref_b, atol=1e-4, rtol=1e-4), "f32 d=256 mismatch"

    # --- bf16 path (sublane=16, f32 widen inside the kernel, cast-back). -----
    x_c = jax.random.normal(k4, (2, 8, d2), dtype=jnp.float32).astype(jnp.bfloat16)
    out_c = jax.block_until_ready(norm_forward(x_c, alpha_b, bias_b))
    ref_c = _reference_norm(x_c, alpha_b, bias_b)
    assert out_c.dtype == jnp.bfloat16
    assert jnp.allclose(
        out_c.astype(jnp.float32), ref_c, atol=5e-2, rtol=5e-2
    ), "bf16 d=256 mismatch"

    print("KERNEL_OK")
</pallas_src>

<mosaic_0001>
module attributes {stable_mosaic.version = 11 : i64} {
  func.func @_norm_kernel(%arg0: i32, %arg1: memref<8x32xf32, #tpu.memory_space<vmem>>, %arg2: memref<1x32xf32, #tpu.memory_space<vmem>>, %arg3: memref<1x32xf32, #tpu.memory_space<vmem>>, %arg4: memref<8x32xf32, #tpu.memory_space<vmem>>) attributes {dimension_semantics = [#tpu.dimension_semantics<parallel>], iteration_bounds = array<i64: 2>, scalar_prefetch = 0 : i64, scratch_operands = 0 : i64, tpu.core_type = #tpu.core_type<tc>, window_params = [{transform_indices = @transform_0, window_bounds = array<i64: 8, 32>}, {pipeline_mode = #tpu.pipeline_mode<synchronous>, transform_indices = @transform_1, window_bounds = array<i64: 1, 32>}, {pipeline_mode = #tpu.pipeline_mode<synchronous>, transform_indices = @transform_2, window_bounds = array<i64: 1, 32>}, {transform_indices = @transform_3, window_bounds = array<i64: 8, 32>}]} {
    %c0 = arith.constant 0 : index
    %c0_0 = arith.constant 0 : index
    %0 = vector.load %arg1[%c0, %c0_0] : memref<8x32xf32, #tpu.memory_space<vmem>>, vector<8x32xf32>
    %cst = arith.constant dense<0.000000e+00> : vector<8xf32>
    %1 = vector.multi_reduction <add>, %0, %cst [1] : vector<8x32xf32> to vector<8xf32>
    %2 = vector.shape_cast %1 : vector<8xf32> to vector<8x1xf32>
    %cst_1 = arith.constant 3.125000e-02 : f32
    %3 = vector.broadcast %cst_1 : f32 to vector<8x1xf32>
    %4 = arith.mulf %2, %3 : vector<8x1xf32>
    %5 = vector.broadcast %4 : vector<8x1xf32> to vector<8x32xf32>
    %6 = arith.subf %0, %5 : vector<8x32xf32>
    %7 = arith.mulf %6, %6 : vector<8x32xf32>
    %cst_2 = arith.constant dense<0.000000e+00> : vector<8xf32>
    %8 = vector.multi_reduction <add>, %7, %cst_2 [1] : vector<8x32xf32> to vector<8xf32>
    %9 = vector.shape_cast %8 : vector<8xf32> to vector<8x1xf32>
    %cst_3 = arith.constant 0.0322580636 : f32
    %10 = vector.broadcast %cst_3 : f32 to vector<8x1xf32>
    %11 = arith.mulf %9, %10 : vector<8x1xf32>
    %cst_4 = arith.constant 0.000000e+00 : f32
    %12 = vector.broadcast %cst_4 : f32 to vector<8x1xf32>
    %13 = arith.maximumf %11, %12 : vector<8x1xf32>
    %14 = math.sqrt %13 : vector<8x1xf32>
    %cst_5 = arith.constant 9.99999997E-7 : f32
    %15 = vector.broadcast %cst_5 : f32 to vector<8x1xf32>
    %16 = arith.addf %14, %15 : vector<8x1xf32>
    %17 = tpu.reciprocal %16 {approx = true} : vector<8x1xf32> -> vector<8x1xf32>
    %18 = arith.mulf %16, %17 : vector<8x1xf32>
    %cst_6 = arith.constant 2.000000e+00 : f32
    %19 = vector.broadcast %cst_6 : f32 to vector<8x1xf32>
    %20 = arith.subf %19, %18 : vector<8x1xf32>
    %21 = arith.mulf %17, %20 : vector<8x1xf32>
    %22 = arith.mulf %16, %21 : vector<8x1xf32>
    %cst_7 = arith.constant 2.000000e+00 : f32
    %23 = vector.broadcast %cst_7 : f32 to vector<8x1xf32>
    %24 = arith.subf %23, %22 : vector<8x1xf32>
    %25 = arith.mulf %21, %24 : vector<8x1xf32>
    %c0_8 = arith.constant 0 : index
    %c0_9 = arith.constant 0 : index
    %26 = vector.load %arg2[%c0_8, %c0_9] : memref<1x32xf32, #tpu.memory_space<vmem>>, vector<1x32xf32>
    %c0_10 = arith.constant 0 : index
    %c0_11 = arith.constant 0 : index
    %27 = vector.load %arg3[%c0_10, %c0_11] : memref<1x32xf32, #tpu.memory_space<vmem>>, vector<1x32xf32>
    %28 = vector.broadcast %25 : vector<8x1xf32> to vector<8x32xf32>
    %29 = arith.mulf %6, %28 : vector<8x32xf32>
    %30 = vector.broadcast %26 : vector<1x32xf32> to vector<8x32xf32>
    %31 = arith.mulf %29, %30 : vector<8x32xf32>
    %32 = vector.broadcast %27 : vector<1x32xf32> to vector<8x32xf32>
    %33 = arith.addf %31, %32 : vector<8x32xf32>
    %c0_12 = arith.constant 0 : index
    %c0_13 = arith.constant 0 : index
    %34 = vector.load %arg4[%c0_12, %c0_13] : memref<8x32xf32, #tpu.memory_space<vmem>>, vector<8x32xf32>
    tpu.vector_store %arg4[%c0_12, %c0_13], %33 {strides = array<i32>} : memref<8x32xf32, #tpu.memory_space<vmem>>, vector<8x32xf32>,
    return
  }
  func.func @transform_0(%arg0: i32) -> (i32, i32) {
    %c0_i32 = arith.constant 0 : i32
    %c0_i32_0 = arith.constant 0 : i32
    return %arg0, %c0_i32 : i32, i32
  }
  func.func @transform_1(%arg0: i32) -> (i32, i32) {
    %c0_i32 = arith.constant 0 : i32
    %c0_i32_0 = arith.constant 0 : i32
    %c0_i32_1 = arith.constant 0 : i32
    return %c0_i32, %c0_i32_0 : i32, i32
  }
  func.func @transform_2(%arg0: i32) -> (i32, i32) {
    %c0_i32 = arith.constant 0 : i32
    %c0_i32_0 = arith.constant 0 : i32
    %c0_i32_1 = arith.constant 0 : i32
    return %c0_i32, %c0_i32_0 : i32, i32
  }
  func.func @transform_3(%arg0: i32) -> (i32, i32) {
    %c0_i32 = arith.constant 0 : i32
    %c0_i32_0 = arith.constant 0 : i32
    return %arg0, %c0_i32 : i32, i32
  }
}

</mosaic_0001>

<bundles_post_ra>
// kernel: tpu_custom_call.1
= control target key start
LH: loop header
LB: loop body
LE: loop exit
PB: predicated region body
PF: predicated region fallthrough
CT: control target
= control target key end

     0   :  { %8 = vsyncpa [#allocation3], 0  ;;  %s674_s0 = inlined_call_operand.hbm [shape: f32[16,32], index: 0, kind: input, shape index: {}]   ;;  %s675_s1 = inlined_call_operand.vmem [shape: f32[1,32], index: 1, kind: input, shape index: {}]   ;;  %s676_s2 = inlined_call_operand.vmem [shape: f32[1,32], index: 2, kind: input, shape index: {}]   ;;  %s677_s3 = inlined_call_operand.hbm [shape: f32[16,32], index: 3, kind: output, shape index: {}]  }
   0x1   :  { %10 = vsyncpa [#allocation3 + $0x1], 0 }
   0x2   :  { %11 = vsyncpa [#allocation4], 0 }
   0x3   :  { %13 = vsyncpa [#allocation4 + $0x1], 0  ;;  %s500_s12 = smov 0   ;;  %s502_s13 = smov 0  }
   0x4   :  { %s504_s14 = smov 0   ;;  %s506_s15 = smov 0  }
   0x5 LB: > { %s521_s16 = sadd.s32 4294967295, %s476_s15   ;;  %s316_s17 = sadd.s32 4294967294, %s476_s15   ;;  %s476_s15 = sphi %s506_s15, %s692_s15   ;;  %s472_s14 = sphi %s504_s14, %s691_s14   ;;  %s468_s13 = sphi %s502_s13, %s690_s13   ;;  %s464_s12 = sphi %s500_s12, %s689_s12  }
   0x6   : > { %s525_s18 = sadd.s32 1, %s476_s15   ;;  %s26_s19 = sadd.s32 1, %s472_s14 }
   0x7   : > { %s23_s20 = ssub.s32 %s476_s15, %s525_s18  ;;  %p33_p0 = scmp.ne.s32.totalorder %s472_s14, %s468_s13 }
   0x8   : > { %p24_p1 = scmp.eq.s32.totalorder %s23_s20, 0  ;;  %p34_p2 = scmp.eq.s32.totalorder %s476_s15, 0 }
   0x9   : > { %p39_p3 = scmp.ne.s32.totalorder %s468_s13, %s464_s12  ;;  %p40_p4 = scmp.eq.s32.totalorder %s521_s16, 0 }
   0xa   : > { %s537_s21 = scalar_select %p24_p1, %s472_s14, %s26_s19  }
   0xb   : > { %p539_p5 = por %p34_p2, %p33_p0  ;;  %p543_p6 = por %p40_p4, %p39_p3 }
   0xc   : > { %p105_p7 = scmp.eq.s32.totalorder %s521_s16, 1  ;;  %p111_p8 = scmp.eq.s32.totalorder %s316_s17, 1 }
   0xd   : > { %p342_p10 = scmp.lt.s32.totalorder %s476_s15, 2  ;;  %s137_s26 = sand.u32 1, %s472_s14  }
   0xe   : > { %p550_p11 = por %p105_p7, %p33_p0  ;;  %p554_p12 = por %p111_p8, %p39_p3 }
   0xf   : > { %s320_s27 = sshll.u32 %s476_s15, 7  ;;  %s319_s28 = sshll.u32 %s137_s26, 3 }
  0x10   : > { %s681_s24 = scalar_select %p550_p11, 1, 0 }
  0x11   : > { %s682_s25 = scalar_select %p554_p12, 1, 0 }
  0x12   : > { %s563_s4 = scalar_lea.hbm %s674_s0, %s320_s27  ;;  %s141_s5 = scalar_lea.vmem [#allocation2], %s319_s28 }
  0x13   : > { %s148_s6 = sshll.u32 %s141_s5, 4  ;;  %p567_p13 = pnand %p342_p10, %p539_p5  ;;  %s571_s6 = int_to_ptr.vmem [resolvable:$true] %s148_s6 }
  0x14   : > { %s138_s8 = scalar_lea.sflag [#allocation3], %s137_s26  ;;  %s380_s9 = scalar_lea.hbm %s563_s4, 128 }
  0x15   : > { %p381_p2 = scmp.ne.s32.totalorder %s563_s4, %s380_s9  ;;  %p382_p3 = pneg %p567_p13 }
  0x16   : > { %s385_s17 = scalar_lea.hbm %s674_s0, 256  ;;  %p386_p5 = scmp.lt.u32.totalorder %s563_s4, %s674_s0 }
  0x17   : > { %p383_p4 = pnand %p382_p3, %p381_p2  ;;  %p387_p8 = scmp.lt.u32.totalorder %s385_s17, %s380_s9 }
  0x18   : > { %p389_p9 = scmp.lt.u32.totalorder %s380_s9, %s563_s4 }
  0x19   : > { %p384_p7 = pneg %p383_p4  ;;  %p388_p10 = por %p387_p8, %p386_p5 }
  0x1b   : > { %p390_p0 = por %p389_p9, %p388_p10 }
  0x1d   : > { %p391_p1 = pnand %p390_p0, %p384_p7 }
  0x1f   : > { %394 = shalt.err (!%p391_p1)
}
  0x20   : > { %s395_s22 = scalar_lea.vmem %s571_s6, 128  ;;  %s478_s26 = smov [#allocation2]  }
  0x21   : > { %p396_p2 = scmp.ne.s32.totalorder %s571_s6, %s395_s22  ;;  %s400_s27 = sshll.u32 %s478_s26, 4  ;;  %s401_s27 = int_to_ptr.vmem [resolvable:$false] %s400_s27 }
  0x22   : > { %s402_s28 = scalar_lea.vmem %s401_s27, 256  ;;  %p403_p11 = scmp.lt.s32.totalorder %s571_s6, %s401_s27 }
  0x23   : > { %p398_p4 = pnand %p396_p2, %p382_p3  ;;  %p404_p5 = scmp.lt.s32.totalorder %s402_s28, %s395_s22 }
  0x25   : > { %p399_p12 = pneg %p398_p4  ;;  %p405_p8 = por %p404_p5, %p403_p11 }
  0x27   : > { %p406_p9 = pnand %p405_p8, %p399_p12 }
  0x29   : > { %409 = shalt.err (!%p406_p9)
}
  0x2a   : > { %337 = dma.hbm_to_vmem [thread:$0]  (!%p567_p13), %s563_s4, 128, %s571_s6, %s138_s8  }
  0x2b   : > { %p684_p0 = scmp.lt.s32.totalorder %s476_s15, 3  ;;  %p685_p1 = scmp.ge.s32.totalorder %s476_s15, 1 }
  0x2d   : > { %p154_p3 = pnand %p685_p1, %p684_p0 }
  0x2e   : > { %s605_s29 = sand.u32 (!%p154_p3), 1, %s468_s13  }
  0x2f   : > { %157 = sbr.rel (%p154_p3) target bundleno = 412 (0x19c), region = 32  ;;  %s322_s30 = sshll.u32 (!%p154_p3), %s605_s29, 3 }
  0x30   : > { %s160_s5 = scalar_lea.sflag (!%p154_p3), [#allocation3], %s605_s29  ;;  %s163_s7 = scalar_lea.vmem (!%p154_p3), [#allocation2], %s322_s30 }
  0x36   : > { %455 = dma.done.wait (%p543_p6), %s160_s5, 128  }
  0x37   : > { %457 = vsyncadd (%p543_p6), %s160_s5, 4294967168  ;;  %vm187_vm0 = vcmask 261120   ;;  %v186_v0 = vld [vmem:[%s163_s7] sm:$0xff]  ;;  %s327_s9 = sshll.u32 %s521_s16, 7  ;;  %s185_s10 = scalar_lea.vmem [#allocation5], %s322_s30 }
  0x38   : > { %v188_v1 = vsel %vm187_vm0, %v186_v0, 0.0  ;;  %v324_v23 = vld [vmem:[%s675_s1] ss:$0 sm:$0xff]  ;;  %s246_s11 = sshll.u32 %s185_s10, 4  ;;  %s629_s20 = scalar_lea.hbm %s677_s3, %s327_s9  ;;  %s631_s11 = int_to_ptr.vmem [resolvable:$true] %s246_s11 }
  0x39   : > { %189 = vadd.xlane.f32.xlu0 %v188_v1  ;;  %v325_v25 = vld [vmem:[%s676_s2] ss:$0 sm:$0xff]  ;;  %s233_s22 = scalar_lea.sflag [#allocation4], %s605_s29  ;;  %s410_s26 = scalar_lea.vmem %s631_s11, 128 }
  0x3a   : > { %p411_p6 = scmp.ne.s32.totalorder %s631_s11, %s410_s26  ;;  %p686_p11 = scmp.ne.s32.totalorder %s681_s24, 0 }
  0x3b   : > { %s479_s16 = smov [#allocation5]  }
  0x3c   : > { %p412_p12 = pnand %p411_p6, %p686_p11  ;;  %s414_s27 = sshll.u32 %s479_s16, 4  ;;  %s415_s27 = int_to_ptr.vmem [resolvable:$false] %s414_s27 }
  0x3d   : > { %s416_s28 = scalar_lea.vmem %s415_s27, 256  ;;  %p417_p7 = scmp.lt.s32.totalorder %s631_s11, %s415_s27 }
  0x3e   : > { %p413_p13 = pneg %p412_p12  ;;  %p418_p10 = scmp.lt.s32.totalorder %s416_s28, %s410_s26 }
  0x40   : > { %p419_p2 = por %p418_p10, %p417_p7 }
  0x42   : > { %p420_p4 = pnand %p419_p2, %p413_p13 }
  0xc6   : > { %v190_v2 = vpop.xlane.xlu0 %189 }
  0xc7   : > { %v191_v3 = vmul.f32 0.03125, %v190_v2 }
  0xc9   : > { %v192_v4 = vsub.f32 %v186_v0, %v191_v3 }
  0xcb   : > { %v193_v5 = vmul.f32 %v192_v4, %v192_v4 }
  0xcd   : > { %v194_v6 = vsel %vm187_vm0, %v193_v5, 0.0 }
  0xce   : > { %195 = vadd.xlane.f32.xlu0 %v194_v6 }
 0x15b   : > { %v196_v7 = vpop.xlane.xlu0 %195 }
 0x15c   : > { %v197_v8 = vmul.f32 0.032258064, %v196_v7 }
 0x15e   : > { %v198_v9 = vmax.f32 %v197_v8, 0.0 }
 0x160   : > { %376 = vrsqrt.f32 %v198_v9  ;;  %vm201_vm1 = vcmp.eq.f32.partialorder %v198_v9, inf  ;;  %v204_v12 = vand.u32 2147483648, %v198_v9  ;;  %vm203_vm2 = vcmp.eq.f32.partialorder %v198_v9, 0.0 }
 0x16a   : > { %v377_v10 = vpop.eup %376 }
 0x16b   : > { %v200_v11 = vmul.f32 %v377_v10, %v198_v9 }
 0x16d   : > { %v202_v13 = vsel %vm201_vm1, %v198_v9, %v200_v11 }
 0x16e   : > { %v205_v14 = vsel %vm203_vm2, %v204_v12, %v202_v13 }
 0x16f   : > { %v206_v15 = vadd.f32 1e-06, %v205_v14 }
 0x171   : > { %378 = vrcp.f32 %v206_v15 }
 0x17b   : > { %v379_v16 = vpop.eup %378 }
 0x17c   : > { %v208_v17 = vmul.f32 %v379_v16, %v206_v15 }
 0x17e   : > { %v209_v18 = vsub.f32 2.0, %v208_v17 }
 0x180   : > { %v210_v19 = vmul.f32 %v379_v16, %v209_v18 }
 0x182   : > { %v211_v20 = vmul.f32 %v210_v19, %v206_v15 }
 0x184   : > { %v212_v21 = vsub.f32 2.0, %v211_v20 }
 0x186   : > { %v213_v22 = vmul.f32 %v212_v21, %v210_v19 }
 0x188   : > { %v216_v24 = vmul.f32 %v213_v22, %v192_v4 }
 0x18a   : > { %v223_v26 = vmul.f32 %v324_v23, %v216_v24 }
 0x18c   : > { %v230_v27 = vadd.f32 %v325_v25, %v223_v26 }
 0x18e   : > { %231 = vst.msk [vmem:[%s185_s10] sm:$0xff] %vm187_vm0, %v230_v27 }
 0x18f   : > { %423 = shalt.err (!%p420_p4)
}
 0x190   : > { %s424_s29 = scalar_lea.hbm %s629_s20, 128  ;;  %s428_s7 = scalar_lea.hbm %s677_s3, 256 }
 0x191   : > { %p425_p5 = scmp.ne.s32.totalorder %s629_s20, %s424_s29  ;;  %p429_p0 = scmp.lt.u32.totalorder %s629_s20, %s677_s3 }
 0x192   : > { %p430_p1 = scmp.lt.u32.totalorder %s428_s7, %s424_s29  ;;  %p432_p6 = scmp.lt.u32.totalorder %s424_s29, %s629_s20 }
 0x193   : > { %p426_p8 = pnand %p425_p5, %p686_p11 }
 0x194   : > { %p431_p3 = por %p430_p1, %p429_p0 }
 0x195   : > { %p427_p9 = pneg %p426_p8 }
 0x196   : > { %p433_p12 = por %p432_p6, %p431_p3 }
 0x198   : > { %p434_p13 = pnand %p433_p12, %p427_p9 }
 0x19a   : > { %437 = shalt.err (!%p434_p13)
}
 0x19b   : > { %332 = dma.vmem_to_hbm [thread:$0]  (%p686_p11), %s631_s11, 128, %s629_s20, %s233_s22  }
 0x19c PF: > { %s258_s6 = sand.u32 1, %s464_s12   ;;  %p687_p7 = scmp.ne.s32.totalorder %s682_s25, 0 }
 0x19d   : > { %p688_p10 = scmp.ge.s32.totalorder %s476_s15, 2  ;;  %s259_s8 = scalar_lea.sflag [#allocation4], %s258_s6 }
 0x19f   : > { %p339_p2 = pnand %p688_p10, %p687_p7 }
 0x1a1   : > { %459 = dma.done.wait (!%p339_p2), %s259_s8, 128  }
 0x1a2   : > { %461 = vsyncadd (!%p339_p2), %s259_s8, 4294967168  ;;  %p16_p4 = scmp.ge.s32.totalorder %s525_s18, 4   ;;  %s689_s12 = smov %s468_s13 }
 0x1a3   : > { %s690_s13 = smov %s472_s14  ;;  %s691_s14 = smov %s537_s21 }
 0x1a4   : > { %s692_s15 = smov %s525_s18  ;;  %18 = sbr.rel (!%p16_p4) target bundleno = 5 (0x5), region = 77 }
 0x1ab   :  { %264 = vsyncpa [#allocation3], 1 }
 0x1ac   :  { %266 = vsyncpa [#allocation3 + $0x1], 1 }
 0x1ad   :  { %267 = vsyncpa [#allocation4], 1 }
 0x1ae   :  { %269 = vsyncpa [#allocation4 + $0x1], 1 }

</bundles_post_ra>
